<compile_context>
chip_gen: v7x
topology: tpu7x:2x2x1
jax: 0.10.0
libtpu: 0.0.40
codegen_flags: <defaults>
</compile_context>

<pallas_src>
import functools

import jax
import jax.numpy as jnp
from jax import lax
from jax.experimental import pallas as pl
from jax.experimental.pallas import tpu as pltpu


# ----------------------------- fused Pallas kernel ---------------------------

def _fused_deconv_bn_relu_kernel(xT_ref, ws_ref, shift_ref, o_ref):
    """Single pass:  o = relu( (scale ⊙ W)^T @ X^T + shift ).

    One MXU matmul + one vadd + one vmax + one lane-dense store per output vreg.
    """
    y = jnp.dot(ws_ref[...], xT_ref[...], preferred_element_type=jnp.float32)
    o_ref[...] = jnp.maximum(y + shift_ref[...], 0.0)


# --------------------------------- helpers -----------------------------------

def _round_up(v, m):
    return ((v + m - 1) // m) * m


def _vmem_limit_bytes():
    """Per-generation scoped-VMEM limit (v5e/v6e: 128 MiB physical, v7x: 64 MiB)."""
    cap = None
    try:
        info_fn = getattr(pltpu, "get_tpu_info", None)
        if info_fn is not None:
            cap = getattr(info_fn(), "vmem_capacity_bytes", None)
    except Exception:
        cap = None
    if not cap:
        cap = 64 * 1024 * 1024          # conservative fallback = v7x physical VMEM
    return int(min(cap * 3 // 4, 96 * 1024 * 1024))


def _derive_tiling(m_total, kc, cin, vmem_limit, block_m):
    """Pick the pixel tile TM (lane axis, multiple of 128) and the padded pixel count."""
    m128 = _round_up(max(m_total, 1), 128)
    if block_m is not None:
        tm = max(128, (int(block_m) // 128) * 128)
    else:
        per_col = 2 * 4 * (kc + cin)     # double-buffered f32 input+output bytes per column
        tm = (int(vmem_limit * 0.6) // per_col // 128) * 128
        tm = max(128, min(tm, 32768))    # diminishing DMA-efficiency returns past ~32K lanes
    tm = min(tm, m128)
    n_tiles = -(-m128 // tm)             # cdiv
    tm = _round_up(-(-m128 // n_tiles), 128)   # rebalance tiles -> padding < 128 cols/tile
    return tm, n_tiles, n_tiles * tm


# --------------------------------- wrapper -----------------------------------

def deconv2d_bn_forward(x, weight, bias, gamma, beta, *, eps=1e-5,
                        block_m=None, channel_major_output=False):
    """x: (N, Cin, H, W) NCHW; weight: (Cin, Cout, 2, 2) (PyTorch ConvTranspose2d layout);
    bias/gamma/beta: (Cout,).  Returns (N, Cout, 2H, 2W) f32 (or a channel-major view)."""
    del bias  # exactly cancelled by train-mode BN mean subtraction (NOT valid for eval stats)
    x = x.astype(jnp.float32)
    weight = weight.astype(jnp.float32)
    n, cin, h, w = x.shape
    cin_w, cout, kh, kw = weight.shape
    assert cin_w == cin and kh == 2 and kw == 2, "this kernel specializes k=2, s=2"
    kk = kh * kw
    kc = cout * kk
    m_total = n * h * w
    ho, wo = h * kh, w * kw
    hp = lax.Precision.HIGHEST

    # ---- host/XLA glue: everything here is Kc/Cin-times smaller than the output --------
    x_t = jnp.transpose(x, (1, 0, 2, 3)).reshape(cin, m_total)          # (Cin, M)
    w_t = jnp.transpose(weight, (1, 2, 3, 0)).reshape(kc, cin)          # (Kc, Cin), row = co*4+kh*2+kw

    # Analytic batch statistics (replaces the v1 stats grid pass + grp matmuls):
    #   sum_m y_r = w_r . sum_m x_m          sum_m y_r^2 = w_r^T (X X^T) w_r
    sx = jnp.sum(x_t, axis=1)                                            # (Cin,)
    gram = jnp.dot(x_t, x_t.T, precision=hp)                             # (Cin, Cin)
    row_sum = jnp.dot(w_t, sx, precision=hp)                             # (Kc,)
    row_ssq = jnp.sum(jnp.dot(w_t, gram, precision=hp) * w_t, axis=1)    # (Kc,)
    count = float(m_total * kk)                                          # per-channel count = N*Ho*Wo
    mean = jnp.sum(row_sum.reshape(cout, kk), axis=1) / count            # (Cout,)
    e_y2 = jnp.sum(row_ssq.reshape(cout, kk), axis=1) / count
    var = jnp.maximum(e_y2 - mean * mean, 0.0)                           # biased var (PyTorch BN)
    inv = lax.rsqrt(var + eps)
    scale = gamma.astype(jnp.float32) * inv                              # (Cout,)
    shift = beta.astype(jnp.float32) - mean * scale                      # (Cout,)

    # Fold the per-channel scale into the tiny weight matrix; shift stays a (Kc,1) input.
    w_scaled = w_t * jnp.repeat(scale, kk)[:, None]                      # (Kc, Cin)
    shift_r = jnp.repeat(shift, kk).reshape(kc, 1)                       # (Kc, 1)

    # ---- tiling: TM from the per-generation VMEM budget, pixel axis zero-padded --------
    vmem_limit = _vmem_limit_bytes()
    tm, n_tiles, mp = _derive_tiling(m_total, kc, cin, vmem_limit, block_m)
    if mp != m_total:
        x_t = jnp.pad(x_t, ((0, 0), (0, mp - m_total)))   # zero cols -> sliced off below

    out_cm = pl.pallas_call(
        _fused_deconv_bn_relu_kernel,
        out_shape=jax.ShapeDtypeStruct((kc, mp), jnp.float32),
        grid=(n_tiles,),
        in_specs=[
            pl.BlockSpec((cin, tm), lambda i: (0, i)),     # X^T tile (streamed once)
            pl.BlockSpec((kc, cin), lambda i: (0, 0)),     # scale-folded W^T (resident)
            pl.BlockSpec((kc, 1), lambda i: (0, 0)),       # per-row BN shift (resident)
        ],
        out_specs=pl.BlockSpec((kc, tm), lambda i: (0, i)),
        compiler_params=pltpu.CompilerParams(
            # No carried state -> the single grid axis is fully parallel (megacore-safe on v7x).
            dimension_semantics=("parallel",),
            vmem_limit_bytes=vmem_limit,
        ),
        cost_estimate=pl.CostEstimate(
            flops=2 * mp * cin * kc + 2 * mp * kc,
            transcendentals=0,
            bytes_accessed=4 * (mp * cin + mp * kc + kc * (cin + 1)),
        ),
    )(x_t, w_scaled, shift_r)

    out_cm = out_cm[:, :m_total]
    if channel_major_output:
        # (co, kh, kw, n, h, w): avoids the full-output NCHW re-touch (review item 7) when
        # the downstream consumer can take channel-major data.
        return out_cm.reshape(cout, kh, kw, n, h, w)
    # NCHW interface glue (re-touches the full output once in XLA).
    out = out_cm.reshape(cout, kh, kw, n, h, w)
    out = jnp.transpose(out, (3, 0, 4, 1, 5, 2)).reshape(n, cout, ho, wo)
    return out


# ----------------------------- reference (pure JAX) ---------------------------

def _reference(x, weight, bias, gamma, beta, eps=1e-5):
    n, cin, h, w = x.shape
    _, cout, kh, kw = weight.shape
    y = jnp.einsum("nchw,cokl->nohkwl", x, weight, precision=lax.Precision.HIGHEST)
    y = y.reshape(n, cout, h * kh, w * kw) + bias[None, :, None, None]
    mean = jnp.mean(y, axis=(0, 2, 3), keepdims=True)
    var = jnp.mean((y - mean) ** 2, axis=(0, 2, 3), keepdims=True)
    out = (y - mean) * lax.rsqrt(var + eps)
    out = out * gamma[None, :, None, None] + beta[None, :, None, None]
    return jnp.maximum(out, 0.0)


# ------------------------------------ main ------------------------------------

if __name__ == "__main__":
    key = jax.random.PRNGKey(0)
    N, Cin, Cout, H, W = 2, 4, 8, 16, 16

    k_x, k_w, k_b, k_g, k_be = jax.random.split(key, 5)
    x = jax.random.normal(k_x, (N, Cin, H, W), dtype=jnp.float32)

    fan = Cin * 2 * 2
    bound = 1.0 / (fan ** 0.5)
    weight = jax.random.uniform(k_w, (Cin, Cout, 2, 2), jnp.float32, -bound, bound)
    bias = jax.random.uniform(k_b, (Cout,), jnp.float32, -bound, bound)
    # Non-trivial affine params to exercise the full BN path (PyTorch defaults are 1 / 0).
    gamma = 1.0 + 0.1 * jax.random.normal(k_g, (Cout,), jnp.float32)
    beta = 0.1 * jax.random.normal(k_be, (Cout,), jnp.float32)

    ref = _reference(x, weight, bias, gamma, beta)

    # 1) auto-tiled path: TM derived from the per-generation VMEM budget.
    fwd_auto = jax.jit(deconv2d_bn_forward)
    out_auto = jax.block_until_ready(fwd_auto(x, weight, bias, gamma, beta))
    assert out_auto.shape == (N, Cout, 2 * H, 2 * W), out_auto.shape
    err_auto = float(jnp.abs(out_auto - ref).max())
    assert jnp.allclose(out_auto, ref, atol=1e-4, rtol=1e-4), err_auto

    # 2) forced small tile so the demo shape (M = N*H*W = 512) exercises a real
    #    multi-tile parallel grid (4 pixel tiles of 128 lanes).
    fwd_small = jax.jit(functools.partial(deconv2d_bn_forward, block_m=128))
    out_small = jax.block_until_ready(fwd_small(x, weight, bias, gamma, beta))
    err_small = float(jnp.abs(out_small - ref).max())
    assert jnp.allclose(out_small, ref, atol=1e-4, rtol=1e-4), err_small

    print("KERNEL_OK")
</pallas_src>

<mosaic_0001>
module attributes {stable_mosaic.version = 11 : i64} {
  func.func @_fused_deconv_bn_relu_kernel(%arg0: i32, %arg1: memref<4x512xf32, #tpu.memory_space<vmem>>, %arg2: memref<32x4xf32, #tpu.memory_space<vmem>>, %arg3: memref<32x1xf32, #tpu.memory_space<vmem>>, %arg4: memref<32x512xf32, #tpu.memory_space<vmem>>) attributes {dimension_semantics = [#tpu.dimension_semantics<parallel>], iteration_bounds = array<i64: 1>, scalar_prefetch = 0 : i64, scratch_operands = 0 : i64, tpu.core_type = #tpu.core_type<tc>, window_params = [{transform_indices = @transform_0, window_bounds = array<i64: 4, 512>}, {pipeline_mode = #tpu.pipeline_mode<synchronous>, transform_indices = @transform_1, window_bounds = array<i64: 32, 4>}, {pipeline_mode = #tpu.pipeline_mode<synchronous>, transform_indices = @transform_2, window_bounds = array<i64: 32, 1>}, {transform_indices = @transform_3, window_bounds = array<i64: 32, 512>}]} {
    %c0 = arith.constant 0 : index
    %c0_0 = arith.constant 0 : index
    %0 = vector.load %arg2[%c0, %c0_0] : memref<32x4xf32, #tpu.memory_space<vmem>>, vector<32x4xf32>
    %c0_1 = arith.constant 0 : index
    %c0_2 = arith.constant 0 : index
    %1 = vector.load %arg1[%c0_1, %c0_2] : memref<4x512xf32, #tpu.memory_space<vmem>>, vector<4x512xf32>
    %cst = arith.constant dense<0.000000e+00> : vector<32x512xf32>
    %2 = tpu.matmul %0, %1, %cst {dimension_numbers = #tpu.dot_dimension_numbers<[1], [0], [0], [1], [0, 0, 1, 1], [], []>} : vector<32x4xf32>, vector<4x512xf32>, vector<32x512xf32> -> vector<32x512xf32>
    %c0_3 = arith.constant 0 : index
    %c0_4 = arith.constant 0 : index
    %3 = vector.load %arg3[%c0_3, %c0_4] : memref<32x1xf32, #tpu.memory_space<vmem>>, vector<32x1xf32>
    %4 = vector.broadcast %3 : vector<32x1xf32> to vector<32x512xf32>
    %5 = arith.addf %2, %4 : vector<32x512xf32>
    %cst_5 = arith.constant 0.000000e+00 : f32
    %6 = vector.broadcast %cst_5 : f32 to vector<32x512xf32>
    %7 = arith.maximumf %5, %6 : vector<32x512xf32>
    %c0_6 = arith.constant 0 : index
    %c0_7 = arith.constant 0 : index
    %8 = vector.load %arg4[%c0_6, %c0_7] : memref<32x512xf32, #tpu.memory_space<vmem>>, vector<32x512xf32>
    tpu.vector_store %arg4[%c0_6, %c0_7], %7 {strides = array<i32>} : memref<32x512xf32, #tpu.memory_space<vmem>>, vector<32x512xf32>,
    return
  }
  func.func @transform_0(%arg0: i32) -> (i32, i32) {
    %c0_i32 = arith.constant 0 : i32
    %c0_i32_0 = arith.constant 0 : i32
    return %c0_i32, %arg0 : i32, i32
  }
  func.func @transform_1(%arg0: i32) -> (i32, i32) {
    %c0_i32 = arith.constant 0 : i32
    %c0_i32_0 = arith.constant 0 : i32
    %c0_i32_1 = arith.constant 0 : i32
    return %c0_i32, %c0_i32_0 : i32, i32
  }
  func.func @transform_2(%arg0: i32) -> (i32, i32) {
    %c0_i32 = arith.constant 0 : i32
    %c0_i32_0 = arith.constant 0 : i32
    %c0_i32_1 = arith.constant 0 : i32
    return %c0_i32, %c0_i32_0 : i32, i32
  }
  func.func @transform_3(%arg0: i32) -> (i32, i32) {
    %c0_i32 = arith.constant 0 : i32
    %c0_i32_0 = arith.constant 0 : i32
    return %c0_i32, %arg0 : i32, i32
  }
}

</mosaic_0001>

<bundles_post_ra>
// kernel: mul.13
= control target key start
LH: loop header
LB: loop body
LE: loop exit
PB: predicated region body
PF: predicated region fallthrough
CT: control target
= control target key end

     0   :  { %s67_s10 = smov 28   ;;  %s68_s11 = smov 20   ;;  %vm3_vm0 = vcmask 31744   ;;  %vm9_vm1 = vcmask 261344   ;;  %vm15_vm2 = vcmask 228544   ;;  %vm21_vm3 = vcmask 195744   ;;  %s111_s0 = inlined_call_operand.vmem [shape: f32[8,4], index: 0, kind: input, shape index: {}]   ;;  %s112_s1 = inlined_call_operand.vmem [shape: f32[32], index: 1, kind: output, shape index: {}]  }
   0x1   :  { %v53_v0 = vld [vmem:[%s111_s0 + $0x7] sm:$0x1]   ;;  %v55_v1 = vld [vmem:[%s111_s0 + $0x5] sm:$0x1]   ;;  %v54_v2 = vld [vmem:[%s111_s0 + $0x6] sm:$0x1]  }
   0x2   :  { %7 = vrot.lane.b32.xlu0 %v53_v0, %s67_s10  ;;  %19 = vrot.lane.b32.xlu1 %v55_v1, %s68_s11  ;;  %v56_v3 = vld [vmem:[%s111_s0 + $0x4] sm:$0x1]   ;;  %v2_v4 = vld [vmem:[%s111_s0] sm:$0x1]   ;;  %s69_s18 = smov 24   ;;  %s70_s19 = smov 16  }
   0x3   :  { %4 = vst.msk [vmem:[#allocation0] sm:$0x1] %vm3_vm0, %v2_v4   ;;  %v57_v5 = vld [vmem:[%s111_s0 + $0x3] sm:$0x1]   ;;  %v58_v6 = vld [vmem:[%s111_s0 + $0x2] sm:$0x1]  }
   0x4   :  { %s71_s24 = smov 12   ;;  %s72_s25 = smov 8   ;;  %v59_v7 = vld [vmem:[%s111_s0 + $0x1] sm:$0x1]   ;;  %vm27_vm4 = vcmask 162944   ;;  %vm33_vm5 = vcmask 130144  }
   0x5   :  { %s73_s0 = smov 4   ;;  %vm39_vm6 = vcmask 97344   ;;  %vm45_vm7 = vcmask 64544  }
   0x6   :  { %13 = vrot.lane.b32.xlu0 %v54_v2, %s69_s18  ;;  %25 = vrot.lane.b32.xlu1 %v56_v3, %s70_s19 }
   0xa   :  { %31 = vrot.lane.b32.xlu0 %v57_v5, %s71_s24  ;;  %37 = vrot.lane.b32.xlu1 %v58_v6, %s72_s25 }
   0xe   :  { %43 = vrot.lane.b32.xlu0 %v59_v7, %s73_s0 }
  0x74   :  { %v8_v8 = vpop.permute.xlu0 %7   ;;  %v20_v9 = vpop.permute.xlu1 %19  }
  0x75   :  { %10 = vst.msk [vmem:[#allocation0] sm:$0x1] %vm9_vm1, %v8_v8  }
  0x78   :  { %v14_v10 = vpop.permute.xlu0 %13   ;;  %v26_v11 = vpop.permute.xlu1 %25  }
  0x79   :  { %16 = vst.msk [vmem:[#allocation0] sm:$0x1] %vm15_vm2, %v14_v10  }
  0x7a   :  { %22 = vst.msk [vmem:[#allocation0] sm:$0x1] %vm21_vm3, %v20_v9  }
  0x7b   :  { %28 = vst.msk [vmem:[#allocation0] sm:$0x1] %vm27_vm4, %v26_v11  }
  0x7c   :  { %v32_v12 = vpop.permute.xlu0 %31   ;;  %v38_v13 = vpop.permute.xlu1 %37  }
  0x7d   :  { %34 = vst.msk [vmem:[#allocation0] sm:$0x1] %vm33_vm5, %v32_v12  }
  0x7e   :  { %40 = vst.msk [vmem:[#allocation0] sm:$0x1] %vm39_vm6, %v38_v13  }
  0x80   :  { %v44_v14 = vpop.permute.xlu0 %43  }
  0x81   :  { %46 = vst.msk [vmem:[#allocation0] sm:$0x1] %vm45_vm7, %v44_v14  }
  0x88   :  { %v50_v15 = vld [vmem:[#allocation0] sm:$0x1] }
  0x89   :  { %52 = vst [vmem:[%s112_s1] sm:$0x1] %v50_v15 }

// kernel: deconv2d_bn_forward.1
= control target key start
LH: loop header
LB: loop body
LE: loop exit
PB: predicated region body
PF: predicated region fallthrough
CT: control target
= control target key end

     0   :  { %vm61_vm0 = vcmask 1043456   ;;  %v302_v2 = vmov 0.0   ;;  %v303_v5 = vmov 0   ;;  %vm48_vm1 = vcmask 31744   ;;  %s414_s0 = inlined_call_operand.vmem [shape: f32[4,512], index: 0, kind: input, shape index: {}]   ;;  %s415_s1 = inlined_call_operand.vmem [shape: f32[32,4], index: 1, kind: input, shape index: {}]   ;;  %s416_s2 = inlined_call_operand.vmem [shape: f32[32,1], index: 2, kind: input, shape index: {}]   ;;  %s417_s3 = inlined_call_operand.vmem [shape: f32[32,512], index: 3, kind: output, shape index: {}]  }
   0x1   :  { %v18_v0 = vld [vmem:[%s414_s0] sm:$0xff]  ;;  %v19_v1 = vld [vmem:[%s414_s0 + $0x8] sm:$0xff]  ;;  %134 = vmatprep.mubr.f32.mxu0 %v302_v2  ;;  %223 = vmatprep.mubr.f32.mxu1 %v302_v2  ;;  %v22_v8 = vld [vmem:[%s416_s2 + $0x10] sm:$0xff] }
   0x2   :  { %v46_v3 = vcombine.high %v18_v0, %v18_v0  ;;  %v47_v4 = vcombine.high %v19_v1, %v19_v1  ;;  %298 = vset.pattern.permute.xlu0 %v303_v5  ;;  %299 = vset.pattern.permute.xlu1 %v303_v5  ;;  %v14_v6 = vld [vmem:[%s415_s1] sm:$0xff]  ;;  %v15_v9 = vld [vmem:[%s415_s1 + $0x8] sm:$0xff]  ;;  %v23_v11 = vld [vmem:[%s416_s2 + $0x18] sm:$0xff] }
   0x3   :  { %v20_v7 = vld [vmem:[%s416_s2] sm:$0xff]  ;;  %36 = vperm.xlu1 %299, %v22_v8   ;;  %v21_v10 = vld [vmem:[%s416_s2 + $0x8] sm:$0xff]  ;;  %v16_v12 = vld [vmem:[%s415_s1 + $0x10] sm:$0xff] }
   0x4   :  { %284 = vmatprep.subr.msk.mxu0 %vm61_vm0, %v46_v3  ;;  %290 = vmatprep.subr.msk.mxu1 %vm61_vm0, %v47_v4  ;;  %v17_v13 = vld [vmem:[%s415_s1 + $0x18] sm:$0xff] }
   0x5   :  { %285 = vmatpush1.msk.msra.mxu0 %vm61_vm0, %v18_v0  ;;  %291 = vmatpush1.msk.msra.mxu1 %vm61_vm0, %v19_v1 }
   0x6   :  { %286 = vmatmul.mubr.msk.f32.vlgmr.msra.gmra.mrb[0].mxu0 %vm48_vm1, %v14_v6  ;;  %292 = vmatmul.mubr.msk.f32.vlgmr.msra.gmra.mrb[0].mxu1 %vm48_vm1, %v14_v6 }
   0x7   :  { %140 = vmatprep.mubr.f32.mxu0 %v302_v2  ;;  %229 = vmatprep.mubr.f32.mxu1 %v302_v2 }
   0x8   :  { %26 = vperm.xlu0 %298, %v20_v7   ;;  %41 = vperm.xlu1 %299, %v23_v11  }
   0xa   :  { %287 = vmatmul.mubr.msk.f32.gmra.mrb[2].mxu0 %vm48_vm1, %v15_v9  ;;  %293 = vmatmul.mubr.msk.f32.gmra.mrb[2].mxu1 %vm48_vm1, %v15_v9 }
   0xb   :  { %146 = vmatprep.mubr.f32.mxu0 %v302_v2  ;;  %235 = vmatprep.mubr.f32.mxu1 %v302_v2 }
   0xc   :  { %31 = vperm.xlu0 %298, %v21_v10  }
   0xe   :  { %288 = vmatmul.mubr.msk.f32.gmra.mrb[4].mxu0 %vm48_vm1, %v16_v12  ;;  %294 = vmatmul.mubr.msk.f32.gmra.mrb[4].mxu1 %vm48_vm1, %v16_v12 }
   0xf   :  { %152 = vmatprep.mubr.f32.mxu0 %v302_v2  ;;  %241 = vmatprep.mubr.f32.mxu1 %v302_v2 }
  0x12   :  { %289 = vmatmul.mubr.msk.f32.gmra.mrb[6].mxu0 %vm48_vm1, %v17_v13  ;;  %295 = vmatmul.mubr.msk.f32.gmra.mrb[6].mxu1 %vm48_vm1, %v17_v13 }
  0x82   :  { %v37_v26 = vpop.permute.xlu1 %36 }
  0x87   :  { %v27_v14 = vpop.permute.xlu0 %26  ;;  %v42_v51 = vpop.permute.xlu1 %41 }
  0x8b   :  { %v32_v23 = vpop.permute.xlu0 %31 }
  0xd9   :  { %v136_v15 = vpop.f32.mrb[0].mxu0  ;;  %v225_v16 = vpop.f32.mrb[0].mxu1 }
  0xda   :  { %v137_v17 = vadd.f32 %v136_v15, %v27_v14  ;;  %v226_v18 = vadd.f32 %v225_v16, %v27_v14  ;;  %v138_v19 = vpop.f32.mrb[1].mxu0  ;;  %v227_v20 = vpop.f32.mrb[1].mxu1 }
  0xdb   :  { %v139_v21 = vadd.f32 %v138_v19, %v27_v14  ;;  %v228_v22 = vadd.f32 %v227_v20, %v27_v14 }
  0xdc   :  { %v248_v24 = vmax.f32 %v137_v17, 0.0  ;;  %v250_v25 = vmax.f32 %v226_v18, 0.0 }
  0xdd   :  { %v249_v27 = vmax.f32 %v139_v21, 0.0  ;;  %v251_v28 = vmax.f32 %v228_v22, 0.0  ;;  %v142_v29 = vpop.f32.mrb[2].mxu0  ;;  %v231_v30 = vpop.f32.mrb[2].mxu1 }
  0xde   :  { %264 = vst [vmem:[%s417_s3] sm:$0xff] %v248_v24  ;;  %266 = vst [vmem:[%s417_s3 + $0x10] sm:$0xff] %v250_v25  ;;  %v143_v31 = vadd.f32 %v142_v29, %v32_v23  ;;  %v232_v32 = vadd.f32 %v231_v30, %v32_v23  ;;  %v144_v33 = vpop.f32.mrb[3].mxu0  ;;  %v233_v34 = vpop.f32.mrb[3].mxu1 }
  0xdf   :  { %265 = vst [vmem:[%s417_s3 + $0x8] sm:$0xff] %v249_v27  ;;  %267 = vst [vmem:[%s417_s3 + $0x18] sm:$0xff] %v251_v28  ;;  %v145_v35 = vadd.f32 %v144_v33, %v32_v23  ;;  %v234_v36 = vadd.f32 %v233_v34, %v32_v23 }
  0xe0   :  { %v252_v37 = vmax.f32 %v143_v31, 0.0  ;;  %v254_v38 = vmax.f32 %v232_v32, 0.0 }
  0xe1   :  { %v253_v39 = vmax.f32 %v145_v35, 0.0  ;;  %v255_v40 = vmax.f32 %v234_v36, 0.0  ;;  %v148_v41 = vpop.f32.mrb[4].mxu0  ;;  %v237_v42 = vpop.f32.mrb[4].mxu1 }
  0xe2   :  { %268 = vst [vmem:[%s417_s3 + $0x20] sm:$0xff] %v252_v37  ;;  %270 = vst [vmem:[%s417_s3 + $0x30] sm:$0xff] %v254_v38  ;;  %v149_v43 = vadd.f32 %v148_v41, %v37_v26  ;;  %v238_v44 = vadd.f32 %v237_v42, %v37_v26  ;;  %v150_v45 = vpop.f32.mrb[5].mxu0  ;;  %v239_v46 = vpop.f32.mrb[5].mxu1 }
  0xe3   :  { %269 = vst [vmem:[%s417_s3 + $0x28] sm:$0xff] %v253_v39  ;;  %271 = vst [vmem:[%s417_s3 + $0x38] sm:$0xff] %v255_v40  ;;  %v151_v47 = vadd.f32 %v150_v45, %v37_v26  ;;  %v240_v48 = vadd.f32 %v239_v46, %v37_v26 }
  0xe4   :  { %v256_v49 = vmax.f32 %v149_v43, 0.0  ;;  %v258_v50 = vmax.f32 %v238_v44, 0.0 }
  0xe5   :  { %v257_v52 = vmax.f32 %v151_v47, 0.0  ;;  %v259_v53 = vmax.f32 %v240_v48, 0.0  ;;  %v154_v54 = vpop.f32.mrb[6].mxu0  ;;  %v243_v55 = vpop.f32.mrb[6].mxu1 }
  0xe6   :  { %272 = vst [vmem:[%s417_s3 + $0x40] sm:$0xff] %v256_v49  ;;  %274 = vst [vmem:[%s417_s3 + $0x50] sm:$0xff] %v258_v50  ;;  %v155_v56 = vadd.f32 %v154_v54, %v42_v51  ;;  %v244_v57 = vadd.f32 %v243_v55, %v42_v51  ;;  %v156_v58 = vpop.f32.mrb[7].mxu0  ;;  %v245_v59 = vpop.f32.mrb[7].mxu1 }
  0xe7   :  { %273 = vst [vmem:[%s417_s3 + $0x48] sm:$0xff] %v257_v52  ;;  %275 = vst [vmem:[%s417_s3 + $0x58] sm:$0xff] %v259_v53  ;;  %v157_v60 = vadd.f32 %v156_v58, %v42_v51  ;;  %v246_v61 = vadd.f32 %v245_v59, %v42_v51 }
  0xe8   :  { %v260_v62 = vmax.f32 %v155_v56, 0.0  ;;  %v262_v63 = vmax.f32 %v244_v57, 0.0 }
  0xe9   :  { %v261_v0 = vmax.f32 %v157_v60, 0.0  ;;  %v263_v1 = vmax.f32 %v246_v61, 0.0 }
  0xea   :  { %276 = vst [vmem:[%s417_s3 + $0x60] sm:$0xff] %v260_v62  ;;  %278 = vst [vmem:[%s417_s3 + $0x70] sm:$0xff] %v262_v63 }
  0xeb   :  { %277 = vst [vmem:[%s417_s3 + $0x68] sm:$0xff] %v261_v0  ;;  %279 = vst [vmem:[%s417_s3 + $0x78] sm:$0xff] %v263_v1 }

</bundles_post_ra>
